<compile_context>
chip_gen: v7x
topology: tpu7x:2x2x1
jax: 0.10.0
libtpu: 0.0.40
codegen_flags: <defaults>
</compile_context>

<pallas_src>
import functools

import jax
import jax.numpy as jnp
from jax import lax
from jax.experimental import pallas as pl
from jax.experimental.pallas import tpu as pltpu

_MIB = 1024 * 1024


def _round_up(x, m):
    return ((x + m - 1) // m) * m


def _vmem_capacity_bytes():
    """Physical VMEM per TensorCore; conservative (v7x-sized) fallback."""
    try:
        return int(pltpu.get_tpu_info().vmem_capacity_bytes)
    except Exception:
        return 64 * _MIB


def _two_tensorcores_per_chip():
    """True on v7x-class chips (2 TensorCores per chip)."""
    try:
        kind = jax.devices()[0].device_kind.lower()
    except Exception:
        return False
    return "v7" in kind


def _sqdiff_rowsum_single_kernel(rec_ref, align_ref, out_ref):
    # Full rows in a single block: no reduction axis, no scratch, no masking.
    d = rec_ref[...].astype(jnp.float32) - align_ref[...].astype(jnp.float32)
    out_ref[...] = jnp.sum(d * d, axis=-1, keepdims=True)


def _sqdiff_rowsum_multi_kernel(rec_ref, align_ref, out_ref, acc_ref, *,
                                n_cols, tile_n, mask_cols):
    # rec_ref / align_ref: (tile_r, tile_n) blocks of the [B*C, H*W] slabs.
    # out_ref: (tile_r, 1) per-row sum of squared differences (resident over k).
    k = pl.program_id(1)
    last_k = pl.num_programs(1) - 1

    @pl.when(k == 0)
    def _():
        acc_ref[...] = jnp.zeros_like(acc_ref)

    d = rec_ref[...].astype(jnp.float32) - align_ref[...].astype(jnp.float32)
    sq = d * d

    if mask_cols:
        # Only the final k step can be ragged; interior steps stay unmasked.
        @pl.when(k != last_k)
        def _():
            acc_ref[...] += jnp.sum(sq, axis=-1, keepdims=True)

        @pl.when(k == last_k)
        def _():
            col = k * tile_n + lax.broadcasted_iota(jnp.int32, sq.shape, 1)
            # Keep the select form: drops NaN/Inf from out-of-bounds garbage.
            sq_m = jnp.where(col < n_cols, sq, jnp.float32(0.0))
            acc_ref[...] += jnp.sum(sq_m, axis=-1, keepdims=True)
    else:
        acc_ref[...] += jnp.sum(sq, axis=-1, keepdims=True)

    @pl.when(k == last_k)
    def _():
        out_ref[...] = acc_ref[...]


def _per_row_sqdiff_sum(rec_2d, align_2d, tile_r, tile_n, vmem_limit_bytes,
                        core_parallel):
    """rec_2d, align_2d: [R, N] -> per-row sum((rec-align)^2), shape [R, 1] f32."""
    R, N = rec_2d.shape
    itemsize = jnp.dtype(rec_2d.dtype).itemsize
    n_row_tiles = pl.cdiv(R, tile_r)
    n_k = pl.cdiv(N, tile_n)

    cost = pl.CostEstimate(
        flops=3 * R * N,
        transcendentals=0,
        bytes_accessed=2 * R * N * itemsize + R * 4)

    if core_parallel:
        row_sem = getattr(pltpu, "CORE_PARALLEL", "parallel")
        red_sem = getattr(pltpu, "ARBITRARY", "arbitrary")
    else:
        row_sem, red_sem = "parallel", "arbitrary"

    if n_k == 1:
        # tile_n == N: blocks are fully contiguous rows.
        kernel = _sqdiff_rowsum_single_kernel
        grid_spec = pltpu.PrefetchScalarGridSpec(
            num_scalar_prefetch=0,
            grid=(n_row_tiles,),
            in_specs=[
                pl.BlockSpec((tile_r, tile_n), lambda i: (i, 0)),
                pl.BlockSpec((tile_r, tile_n), lambda i: (i, 0)),
            ],
            out_specs=pl.BlockSpec((tile_r, 1), lambda i: (i, 0)),
        )
        dims = (row_sem,)
    else:
        mask_cols = (N % tile_n) != 0
        kernel = functools.partial(
            _sqdiff_rowsum_multi_kernel,
            n_cols=N, tile_n=tile_n, mask_cols=mask_cols)
        grid_spec = pltpu.PrefetchScalarGridSpec(
            num_scalar_prefetch=0,
            grid=(n_row_tiles, n_k),
            in_specs=[
                pl.BlockSpec((tile_r, tile_n), lambda i, k: (i, k)),
                pl.BlockSpec((tile_r, tile_n), lambda i, k: (i, k)),
            ],
            out_specs=pl.BlockSpec((tile_r, 1), lambda i, k: (i, 0)),
            scratch_shapes=[pltpu.VMEM((tile_r, 1), jnp.float32)],
        )
        dims = (row_sem, red_sem)

    return pl.pallas_call(
        kernel,
        out_shape=jax.ShapeDtypeStruct((R, 1), jnp.float32),
        grid_spec=grid_spec,
        compiler_params=pltpu.CompilerParams(
            dimension_semantics=dims,
            vmem_limit_bytes=vmem_limit_bytes),
        cost_estimate=cost,
    )(rec_2d, align_2d)


def feature_mse_loss(feature_rec, feature_align, outplanes, return_type="sum",
                     max_tile_n=4096, max_block_bytes=None):
    """JAX/Pallas equivalent of FeatureMSELoss.forward.

    feature_rec, feature_align: [B, C_total, H, W]  (NCHW, like PyTorch)
    outplanes: static Python list of ints, sum(outplanes) == C_total
    """
    B, C, H, W = feature_rec.shape
    assert sum(outplanes) == C
    R = B * C
    N = H * W

    # Contiguous views only: no transpose, no pad -> no extra HBM copies.
    rec_2d = feature_rec.reshape(R, N)
    align_2d = feature_align.reshape(R, N)

    itemsize = jnp.dtype(feature_rec.dtype).itemsize
    sublane = 16 if itemsize == 2 else 8      # bf16 needs 16-row sublane packing

    vmem_cap = _vmem_capacity_bytes()
    two_cores = _two_tensorcores_per_chip()
    if max_block_bytes is None:
        # ~6 MiB blocks on v5e/v6e (128 MiB VMEM), ~4 MiB on v7x (64 MiB VMEM).
        max_block_bytes = 6 * _MIB if vmem_cap >= 96 * _MIB else 4 * _MIB

    # Lane axis: prefer full (fully contiguous) rows whenever a sublane-group
    # of full rows fits the block budget; only very wide rows get lane-tiled.
    row_bytes = N * itemsize
    if sublane * row_bytes <= max_block_bytes:
        tile_n = N
    else:
        tile_n = max(128, (max_tile_n // 128) * 128)
        if tile_n >= N:
            tile_n = N

    # Row axis: fill the block budget, sublane-aligned (full R is always legal).
    row_cap = max(sublane,
                  (max_block_bytes // max(1, tile_n * itemsize)) // sublane * sublane)
    tile_r = R if R <= row_cap else row_cap

    # On 2-TC chips keep at least two row tiles so both cores get work.
    if two_cores and R > sublane and pl.cdiv(R, tile_r) < 2:
        half = _round_up((R + 1) // 2, sublane)
        tile_r = min(tile_r, max(sublane, half))

    # Scoped VMEM limit: real footprint is 2 inputs x 2 pipeline buffers x block
    # (+ tiny out/acc scratch); add headroom, never request the whole core VMEM.
    block_bytes = tile_r * tile_n * itemsize
    vmem_limit = int(min(0.7 * vmem_cap,
                         max(32 * _MIB, 4 * block_bytes + 8 * _MIB)))

    per_row = _per_row_sqdiff_sum(rec_2d, align_2d, tile_r, tile_n,
                                  vmem_limit, two_cores)[:, 0]        # (B*C,)
    per_ch = per_row.reshape(B, C).sum(axis=0)                        # (C,)

    # Per-group mean (nn.MSELoss default reduction='mean'), then sum over groups.
    losses = []
    start = 0
    for cg in outplanes:
        group_sum = jnp.sum(per_ch[start:start + cg])
        losses.append(group_sum / jnp.float32(B * cg * H * W))
        start += cg
    total = functools.reduce(lambda a, b: a + b, losses)
    if return_type == "sum":
        return total
    return total / jnp.float32(len(losses))


if __name__ == "__main__":
    key = jax.random.PRNGKey(0)
    k1, k2, k3, k4, k5, k6 = jax.random.split(key, 6)

    def ref_loss(fr_all, fa_all, outplanes, return_type="sum"):
        # Pure-JAX reference with the same semantics as the PyTorch module.
        losses = []
        start = 0
        for cg in outplanes:
            fr = fr_all[:, start:start + cg].astype(jnp.float32)
            fa = fa_all[:, start:start + cg].astype(jnp.float32)
            losses.append(jnp.mean((fr - fa) ** 2))
            start += cg
        total = sum(losses)
        return total if return_type == "sum" else total / len(losses)

    # Test 1: default tiling (single full-row block, 1-D grid), return_type='sum'.
    B, H, W = 2, 16, 16
    outplanes = [4, 8, 4]
    C = sum(outplanes)
    feature_rec = jax.random.normal(k1, (B, C, H, W), dtype=jnp.float32)
    feature_align = jax.random.normal(k2, (B, C, H, W), dtype=jnp.float32)
    loss = jax.block_until_ready(
        feature_mse_loss(feature_rec, feature_align, outplanes, "sum"))
    ref = ref_loss(feature_rec, feature_align, outplanes, "sum")
    assert jnp.allclose(loss, ref, rtol=1e-5, atol=1e-6), (loss, ref)

    # Test 2: forced multi-step reduction axis with ragged rows AND ragged
    # columns (gated column masking, garbage OOB rows), return_type='mean'.
    outplanes2 = [2, 3, 1]
    C2 = sum(outplanes2)
    H2, W2 = 16, 17                           # N = 272: not a multiple of 128
    fr2 = jax.random.normal(k3, (B, C2, H2, W2), dtype=jnp.float32)
    fa2 = jax.random.normal(k4, (B, C2, H2, W2), dtype=jnp.float32)
    loss2 = jax.block_until_ready(
        feature_mse_loss(fr2, fa2, outplanes2, "mean",
                         max_tile_n=128, max_block_bytes=8 * 128 * 4))
    ref2 = ref_loss(fr2, fa2, outplanes2, "mean")
    assert jnp.allclose(loss2, ref2, rtol=1e-5, atol=1e-6), (loss2, ref2)

    # Test 3: bf16 inputs (16-row sublane tiles, f32 in-kernel accumulation).
    outplanes3 = [3, 5]
    C3 = sum(outplanes3)
    fr3 = jax.random.normal(k5, (B, C3, H, W), dtype=jnp.bfloat16)
    fa3 = jax.random.normal(k6, (B, C3, H, W), dtype=jnp.bfloat16)
    loss3 = jax.block_until_ready(
        feature_mse_loss(fr3, fa3, outplanes3, "sum"))
    ref3 = ref_loss(fr3, fa3, outplanes3, "sum")
    assert jnp.allclose(loss3, ref3, rtol=1e-4, atol=1e-5), (loss3, ref3)

    print("KERNEL_OK")
</pallas_src>

<mosaic_0001>
module attributes {stable_mosaic.version = 11 : i64} {
  func.func @_sqdiff_rowsum_single_kernel(%arg0: i32, %arg1: memref<32x256xf32, #tpu.memory_space<vmem>>, %arg2: memref<32x256xf32, #tpu.memory_space<vmem>>, %arg3: memref<32x1xf32, #tpu.memory_space<vmem>>) attributes {dimension_semantics = [#tpu.dimension_semantics<parallel>], iteration_bounds = array<i64: 1>, scalar_prefetch = 0 : i64, scratch_operands = 0 : i64, tpu.core_type = #tpu.core_type<tc>, window_params = [{transform_indices = @transform_0, window_bounds = array<i64: 32, 256>}, {transform_indices = @transform_1, window_bounds = array<i64: 32, 256>}, {transform_indices = @transform_2, window_bounds = array<i64: 32, 1>}]} {
    %c0 = arith.constant 0 : index
    %c0_0 = arith.constant 0 : index
    %0 = vector.load %arg1[%c0, %c0_0] : memref<32x256xf32, #tpu.memory_space<vmem>>, vector<32x256xf32>
    %c0_1 = arith.constant 0 : index
    %c0_2 = arith.constant 0 : index
    %1 = vector.load %arg2[%c0_1, %c0_2] : memref<32x256xf32, #tpu.memory_space<vmem>>, vector<32x256xf32>
    %2 = arith.subf %0, %1 : vector<32x256xf32>
    %3 = arith.mulf %2, %2 : vector<32x256xf32>
    %cst = arith.constant dense<0.000000e+00> : vector<32xf32>
    %4 = vector.multi_reduction <add>, %3, %cst [1] : vector<32x256xf32> to vector<32xf32>
    %5 = vector.shape_cast %4 : vector<32xf32> to vector<32x1xf32>
    %c0_3 = arith.constant 0 : index
    %c0_4 = arith.constant 0 : index
    %6 = vector.load %arg3[%c0_3, %c0_4] : memref<32x1xf32, #tpu.memory_space<vmem>>, vector<32x1xf32>
    tpu.vector_store %arg3[%c0_3, %c0_4], %5 {strides = array<i32>} : memref<32x1xf32, #tpu.memory_space<vmem>>, vector<32x1xf32>,
    return
  }
  func.func @transform_0(%arg0: i32) -> (i32, i32) {
    %c0_i32 = arith.constant 0 : i32
    %c0_i32_0 = arith.constant 0 : i32
    return %arg0, %c0_i32 : i32, i32
  }
  func.func @transform_1(%arg0: i32) -> (i32, i32) {
    %c0_i32 = arith.constant 0 : i32
    %c0_i32_0 = arith.constant 0 : i32
    return %arg0, %c0_i32 : i32, i32
  }
  func.func @transform_2(%arg0: i32) -> (i32, i32) {
    %c0_i32 = arith.constant 0 : i32
    %c0_i32_0 = arith.constant 0 : i32
    return %arg0, %c0_i32 : i32, i32
  }
}

</mosaic_0001>

<bundles_post_ra>
// kernel: tpu_custom_call.1
= control target key start
LH: loop header
LB: loop body
LE: loop exit
PB: predicated region body
PF: predicated region fallthrough
CT: control target
= control target key end

     0   :  { %7 = vsyncpa [#allocation3], 0  ;;  %s201_s0 = inlined_call_operand.hbm [shape: f32[32,256], index: 0, kind: input, shape index: {}]   ;;  %s202_s1 = inlined_call_operand.hbm [shape: f32[32,256], index: 1, kind: input, shape index: {}]   ;;  %s203_s2 = inlined_call_operand.vmem [shape: f32[32,1], index: 2, kind: output, shape index: {}]  }
   0x1   :  { %8 = vsyncpa [#allocation5], 0  ;;  %s146_s9 = smov [#allocation2]   ;;  %s98_s13 = scalar_lea.hbm %s201_s0, 1024 }
   0x2   :  { %s14_s10 = sshll.u32 %s146_s9, 4  ;;  %p99_p0 = scmp.ne.s32.totalorder %s201_s0, %s98_s13  ;;  %s15_s10 = int_to_ptr.vmem [resolvable:$true] %s14_s10 }
   0x3   :  { %p102_p1 = scmp.lt.u32.totalorder %s98_s13, %s201_s0 }
   0x5   :  { %p104_p2 = pnand %p102_p1, %p99_p0 }
   0x7   :  { %107 = shalt.err (!%p104_p2)
}
   0x8   :  { %s108_s18 = scalar_lea.vmem %s15_s10, 1024  ;;  %p113_p4 = scmp.lt.s32.totalorder %s15_s10, %s15_s10 }
   0x9   :  { %p109_p3 = scmp.ne.s32.totalorder %s15_s10, %s108_s18  ;;  %p114_p5 = scmp.lt.s32.totalorder %s108_s18, %s108_s18 }
   0xb   :  { %p115_p6 = por %p114_p5, %p113_p4 }
   0xd   :  { %p116_p7 = pnand %p115_p6, %p109_p3 }
   0xf   :  { %119 = shalt.err (!%p116_p7)
}
  0x10   :  { %s147_s19 = smov 256   ;;  %s148_s20 = smov 16  }
  0x11   :  { %20 = dma.hbm_to_vmem [thread:$0]  %s201_s0, 1024, %s15_s10, [#allocation3], %s147_s19, %s147_s19, %s148_s20  }
  0x12   :  { %s149_s23 = smov [#allocation4]   ;;  %s120_s27 = scalar_lea.hbm %s202_s1, 1024 }
  0x13   :  { %s26_s24 = sshll.u32 %s149_s23, 4  ;;  %p121_p8 = scmp.ne.s32.totalorder %s202_s1, %s120_s27  ;;  %s27_s24 = int_to_ptr.vmem [resolvable:$true] %s26_s24 }
  0x14   :  { %p124_p9 = scmp.lt.u32.totalorder %s120_s27, %s202_s1 }
  0x16   :  { %p126_p10 = pnand %p124_p9, %p121_p8 }
  0x18   :  { %129 = shalt.err (!%p126_p10)
}
  0x19   :  { %s130_s4 = scalar_lea.vmem %s27_s24, 1024  ;;  %p135_p12 = scmp.lt.s32.totalorder %s27_s24, %s27_s24 }
  0x1a   :  { %p131_p11 = scmp.ne.s32.totalorder %s27_s24, %s130_s4  ;;  %p136_p13 = scmp.lt.s32.totalorder %s130_s4, %s130_s4 }
  0x1c   :  { %p137_p0 = por %p136_p13, %p135_p12 }
  0x1e   :  { %p138_p1 = pnand %p137_p0, %p131_p11 }
  0x20   :  { %141 = shalt.err (!%p138_p1)
}
  0x21   :  { %32 = dma.hbm_to_vmem [thread:$0]  %s202_s1, 1024, %s27_s24, [#allocation5], %s147_s19, %s147_s19, %s148_s20  }
  0x22   :  { %142 = dma.done.wait [#allocation3], 1024  }
  0x23   :  { %143 = vsyncadd [#allocation3], 4294966272 }
  0x24   :  { %144 = dma.done.wait [#allocation5], 1024  }
  0x25   :  { %145 = vsyncadd [#allocation5], 4294966272  ;;  %v43_v0 = vld [vmem:[#allocation2 + $0x20] sm:$0xff]  ;;  %v44_v1 = vld [vmem:[#allocation2 + $0x28] sm:$0xff]  ;;  %vm83_vm0 = vcmask 7168  }
  0x26   :  { %v51_v2 = vld [vmem:[#allocation4 + $0x20] sm:$0xff]  ;;  %v52_v3 = vld [vmem:[#allocation4 + $0x28] sm:$0xff]  ;;  %v45_v10 = vld [vmem:[#allocation2 + $0x30] sm:$0xff] }
  0x27   :  { %v59_v4 = vsub.f32 %v43_v0, %v51_v2  ;;  %v39_v5 = vld [vmem:[#allocation2] sm:$0xff]  ;;  %v40_v6 = vld [vmem:[#allocation2 + $0x8] sm:$0xff]  ;;  %v60_v7 = vsub.f32 %v44_v1, %v52_v3  ;;  %v46_v14 = vld [vmem:[#allocation2 + $0x38] sm:$0xff] }
  0x28   :  { %v47_v8 = vld [vmem:[#allocation4] sm:$0xff]  ;;  %v48_v9 = vld [vmem:[#allocation4 + $0x8] sm:$0xff]  ;;  %v53_v15 = vld [vmem:[#allocation4 + $0x30] sm:$0xff] }
  0x29   :  { %v67_v11 = vmul.f32 %v59_v4, %v59_v4  ;;  %v55_v12 = vsub.f32 %v39_v5, %v47_v8  ;;  %v56_v13 = vsub.f32 %v40_v6, %v48_v9  ;;  %v54_v16 = vld [vmem:[#allocation4 + $0x38] sm:$0xff]  ;;  %v68_v17 = vmul.f32 %v60_v7, %v60_v7  ;;  %v41_v20 = vld [vmem:[#allocation2 + $0x10] sm:$0xff] }
  0x2a   :  { %v61_v18 = vsub.f32 %v45_v10, %v53_v15  ;;  %v62_v19 = vsub.f32 %v46_v14, %v54_v16  ;;  %v42_v21 = vld [vmem:[#allocation2 + $0x18] sm:$0xff]  ;;  %v49_v22 = vld [vmem:[#allocation4 + $0x10] sm:$0xff] }
  0x2b   :  { %v63_v23 = vmul.f32 %v55_v12, %v55_v12  ;;  %v64_v24 = vmul.f32 %v56_v13, %v56_v13  ;;  %v50_v25 = vld [vmem:[#allocation4 + $0x18] sm:$0xff]  ;;  %v57_v26 = vsub.f32 %v41_v20, %v49_v22  ;;  %v77_v27 = vadd.f32 %v68_v17, %v67_v11 }
  0x2c   :  { %v69_v28 = vmul.f32 %v61_v18, %v61_v18  ;;  %v70_v29 = vmul.f32 %v62_v19, %v62_v19  ;;  %v58_v30 = vsub.f32 %v42_v21, %v50_v25 }
  0x2d   :  { %v71_v31 = vadd.f32 %v64_v24, %v63_v23  ;;  %v65_v32 = vmul.f32 %v57_v26, %v57_v26  ;;  %78 = vadd.xlane.f32.xlu1 %v77_v27 }
  0x2e   :  { %v80_v33 = vadd.f32 %v70_v29, %v69_v28  ;;  %v66_v34 = vmul.f32 %v58_v30, %v58_v30 }
  0x2f   :  { %72 = vadd.xlane.f32.xlu0 %v71_v31 }
  0x30   :  { %v74_v35 = vadd.f32 %v66_v34, %v65_v32 }
  0x31   :  { %81 = vadd.xlane.f32.xlu1 %v80_v33 }
  0x33   :  { %75 = vadd.xlane.f32.xlu0 %v74_v35 }
  0xba   :  { %v79_v36 = vpop.xlane.xlu1 %78 }
  0xbb   :  { %86 = vst.msk [vmem:[%s203_s2 + $0x10] sm:$0xff] %vm83_vm0, %v79_v36 }
  0xbc   :  { %v73_v37 = vpop.xlane.xlu0 %72 }
  0xbd   :  { %84 = vst.msk [vmem:[%s203_s2] sm:$0xff] %vm83_vm0, %v73_v37 }
  0xbe   :  { %v82_v38 = vpop.xlane.xlu1 %81 }
  0xbf   :  { %87 = vst.msk [vmem:[%s203_s2 + $0x18] sm:$0xff] %vm83_vm0, %v82_v38 }
  0xc0   :  { %v76_v39 = vpop.xlane.xlu0 %75 }
  0xc1   :  { %85 = vst.msk [vmem:[%s203_s2 + $0x8] sm:$0xff] %vm83_vm0, %v76_v39 }
  0xc2   :  { %92 = vsyncpa [#allocation3], 1 }
  0xc3   :  { %93 = vsyncpa [#allocation5], 1 }

</bundles_post_ra>
